<compile_context>
chip_gen: v7x
topology: tpu7x:2x2x1
jax: 0.10.0
libtpu: 0.0.40
codegen_flags: <defaults>
</compile_context>

<pallas_src>
import jax
import jax.numpy as jnp
from jax import lax
from jax.experimental import pallas as pl
from jax.experimental.pallas import tpu as pltpu


def _round_up(v, m):
    return ((v + m - 1) // m) * m


def _make_kernel(H, h_block, chunk_h):
    def kernel(x_ref, g_ref, b_ref, w1_ref, b1_ref, w2_ref, b2_ref, o_ref):
        x = x_ref[...].astype(jnp.float32)                       # (rt, D)

        # ---- LayerNorm over last dim (population variance, eps=1e-5, affine) ----
        mean = jnp.mean(x, axis=-1, keepdims=True)
        xc = x - mean
        var = jnp.mean(xc * xc, axis=-1, keepdims=True)
        xn = xc * lax.rsqrt(var + 1e-5)
        xn = xn * g_ref[...].astype(jnp.float32) + b_ref[...].astype(jnp.float32)
        xn_b = xn.astype(jnp.bfloat16)                           # bf16 MXU operand

        # ---- fn: Linear -> GELU (tanh approx, EUP) -> Linear, f32 accumulate ----
        # NOTE: tanh-approximate GELU; torch nn.GELU() default (exact erf) differs
        # by up to ~1e-3.
        if not chunk_h:
            h = jnp.dot(xn_b, w1_ref[...],
                        preferred_element_type=jnp.float32) + b1_ref[...]
            h = jax.nn.gelu(h, approximate=True)
            y = jnp.dot(h.astype(jnp.bfloat16), w2_ref[...],
                        preferred_element_type=jnp.float32)
        else:
            # Very large hidden dim: bound the live intermediate to (rt, h_block).
            n_chunks = H // h_block

            def body(c, acc):
                off = pl.multiple_of(c * h_block, h_block)
                hc = jnp.dot(xn_b, w1_ref[:, pl.ds(off, h_block)],
                             preferred_element_type=jnp.float32)
                hc = hc + b1_ref[:, pl.ds(off, h_block)]
                hc = jax.nn.gelu(hc, approximate=True)
                return acc + jnp.dot(hc.astype(jnp.bfloat16),
                                     w2_ref[pl.ds(off, h_block), :],
                                     preferred_element_type=jnp.float32)

            y = lax.fori_loop(0, n_chunks, body, jnp.zeros_like(x), unroll=True)

        y = y + b2_ref[...]
        o_ref[...] = (y + x).astype(o_ref.dtype)                 # residual add

    return kernel


def prenorm_residual(x, gamma, beta, w1, b1, w2, b2, *, row_tile=512, h_block=2048):
    B, N, D = x.shape
    H = w1.shape[1]
    M = B * N
    itm = jnp.dtype(x.dtype).itemsize

    # TODO(synk): if the model dim D is not a multiple of 128 (e.g. token-mixing
    # D=196), pad weights/params once on the host and mask the LN statistics so
    # the output stays lane-dense; not needed for the shapes exercised here.

    # Physical VMEM capacity (per TensorCore); conservative fallback if the
    # trace-time query is unavailable.
    try:
        vmem_cap = int(pltpu.get_tpu_info().vmem_capacity_bytes)
    except Exception:
        vmem_cap = 64 * 2**20

    # Row tiling: sublane-aligned, clamped to the problem size. No host-side
    # padding: the grid uses cdiv(M, rt) and the ragged last tile is discarded
    # on write (rows are independent, so garbage rows never contaminate valid ones).
    min_rows = 16 if itm < 4 else 8
    rt = max(min_rows, min(row_tile, _round_up(M, min_rows)))
    rt = _round_up(rt, min_rows)
    grid_m = pl.cdiv(M, rt)

    x2 = x.reshape(M, D)

    # Only chunk H when the (rt, H) f32 intermediate actually threatens VMEM.
    hidden_bytes = rt * H * 4
    chunk_h = (H > h_block) and (H % h_block == 0) and \
              (hidden_bytes > max(8 * 2**20, vmem_cap // 8))
    h_live = h_block if chunk_h else H

    # bf16 weights for the MXU; LN params / biases stay f32.
    w1b = w1.astype(jnp.bfloat16)
    w2b = w2.astype(jnp.bfloat16)
    g = gamma.reshape(1, D).astype(jnp.float32)
    be = beta.reshape(1, D).astype(jnp.float32)
    b1f = b1.reshape(1, H).astype(jnp.float32)
    b2f = b2.reshape(1, D).astype(jnp.float32)

    # Explicit single-buffer decision for the grid-invariant weights: only worth
    # it when a second weight buffer would eat a meaningful slice of VMEM
    # (mainly v7x with large Mixer hidden dims).  Otherwise use plain specs.
    w_bytes = 2 * D * H * 2                                     # W1 + W2 in bf16
    single_buffer_weights = (2 * w_bytes) > (vmem_cap // 4)
    n_w_buf = 1 if single_buffer_weights else 2

    kernel = _make_kernel(H, h_block, chunk_h)

    # VMEM budget: double-buffered x/out tiles + resident bf16 weights + f32
    # intermediates, clamped to ~75% of physical VMEM for the generation.
    vmem_est = (2 * 2 * rt * D * itm                 # x + out tiles (double buffered)
                + n_w_buf * w_bytes                  # resident bf16 weights
                + rt * (h_live + 2 * D) * 4          # hidden intermediate + f32 x / acc
                + 4 * (3 * D + H))                   # small param vectors
    vmem_limit = int(min(int(0.75 * vmem_cap), max(32 * 2**20, 2 * vmem_est)))

    cost = pl.CostEstimate(
        flops=4 * M * D * H,                         # two matmuls: 2*M*D*H each
        transcendentals=M * H,                       # one tanh per hidden element
        bytes_accessed=2 * M * D * itm + w_bytes + 4 * (3 * D + H))

    wkw = {"pipeline_mode": pl.Buffered(1)} if single_buffer_weights else {}

    out2 = pl.pallas_call(
        kernel,
        out_shape=jax.ShapeDtypeStruct((M, D), x.dtype),
        grid_spec=pltpu.PrefetchScalarGridSpec(
            num_scalar_prefetch=0,
            grid=(grid_m,),
            in_specs=[
                pl.BlockSpec((rt, D), lambda i: (i, 0)),          # x rows
                pl.BlockSpec((1, D), lambda i: (0, 0)),           # gamma
                pl.BlockSpec((1, D), lambda i: (0, 0)),           # beta
                pl.BlockSpec((D, H), lambda i: (0, 0), **wkw),    # W1 (bf16, resident)
                pl.BlockSpec((1, H), lambda i: (0, 0)),           # b1
                pl.BlockSpec((H, D), lambda i: (0, 0), **wkw),    # W2 (bf16, resident)
                pl.BlockSpec((1, D), lambda i: (0, 0)),           # b2
            ],
            out_specs=pl.BlockSpec((rt, D), lambda i: (i, 0)),
        ),
        compiler_params=pltpu.CompilerParams(
            dimension_semantics=("parallel",),
            vmem_limit_bytes=vmem_limit),
        cost_estimate=cost,
    )(x2, g, be, w1b, b1f, w2b, b2f)

    return out2.reshape(B, N, D)


if __name__ == "__main__":
    # Small shapes: batch=2, tokens=8, dim=32, hidden=64
    B, N, D, H = 2, 8, 32, 64

    key = jax.random.PRNGKey(0)
    kx, kw1, kb1, kw2, kb2 = jax.random.split(key, 5)

    x = jax.random.normal(kx, (B, N, D), dtype=jnp.float32)

    # LayerNorm params (torch init: weight=1, bias=0)
    gamma = jnp.ones((1, D), dtype=jnp.float32)
    beta = jnp.zeros((1, D), dtype=jnp.float32)

    # FeedForward params, deterministic small init
    w1 = jax.random.normal(kw1, (D, H), dtype=jnp.float32) * 0.02
    b1 = jax.random.normal(kb1, (1, H), dtype=jnp.float32) * 0.02
    w2 = jax.random.normal(kw2, (H, D), dtype=jnp.float32) * 0.02
    b2 = jax.random.normal(kb2, (1, D), dtype=jnp.float32) * 0.02

    out = prenorm_residual(x, gamma, beta, w1, b1, w2, b2)
    jax.block_until_ready(out)

    # Pure-JAX f32 reference (same tanh-approx GELU; bf16 MXU inputs in the
    # kernel only introduce small rounding differences).
    mean = jnp.mean(x, axis=-1, keepdims=True)
    var = jnp.mean((x - mean) ** 2, axis=-1, keepdims=True)
    xn = (x - mean) * lax.rsqrt(var + 1e-5) * gamma[0] + beta[0]
    h = jax.nn.gelu(xn @ w1 + b1[0], approximate=True)
    ref = h @ w2 + b2[0] + x

    assert jnp.allclose(out, ref, atol=5e-3, rtol=5e-3), \
        float(jnp.max(jnp.abs(out - ref)))

    print("KERNEL_OK")
</pallas_src>

<mosaic_0001>
module attributes {stable_mosaic.version = 11 : i64} {
  func.func @kernel(%arg0: i32, %arg1: memref<16x32xf32, #tpu.memory_space<vmem>>, %arg2: memref<1x32xf32, #tpu.memory_space<vmem>>, %arg3: memref<1x32xf32, #tpu.memory_space<vmem>>, %arg4: memref<32x64xbf16, #tpu.memory_space<vmem>>, %arg5: memref<1x64xf32, #tpu.memory_space<vmem>>, %arg6: memref<64x32xbf16, #tpu.memory_space<vmem>>, %arg7: memref<1x32xf32, #tpu.memory_space<vmem>>, %arg8: memref<16x32xf32, #tpu.memory_space<vmem>>) attributes {dimension_semantics = [#tpu.dimension_semantics<parallel>], iteration_bounds = array<i64: 1>, scalar_prefetch = 0 : i64, scratch_operands = 0 : i64, tpu.core_type = #tpu.core_type<tc>, window_params = [{transform_indices = @transform_0, window_bounds = array<i64: 16, 32>}, {pipeline_mode = #tpu.pipeline_mode<synchronous>, transform_indices = @transform_1, window_bounds = array<i64: 1, 32>}, {pipeline_mode = #tpu.pipeline_mode<synchronous>, transform_indices = @transform_2, window_bounds = array<i64: 1, 32>}, {pipeline_mode = #tpu.pipeline_mode<synchronous>, transform_indices = @transform_3, window_bounds = array<i64: 32, 64>}, {pipeline_mode = #tpu.pipeline_mode<synchronous>, transform_indices = @transform_4, window_bounds = array<i64: 1, 64>}, {pipeline_mode = #tpu.pipeline_mode<synchronous>, transform_indices = @transform_5, window_bounds = array<i64: 64, 32>}, {pipeline_mode = #tpu.pipeline_mode<synchronous>, transform_indices = @transform_6, window_bounds = array<i64: 1, 32>}, {transform_indices = @transform_7, window_bounds = array<i64: 16, 32>}]} {
    %c0 = arith.constant 0 : index
    %c0_0 = arith.constant 0 : index
    %0 = vector.load %arg1[%c0, %c0_0] : memref<16x32xf32, #tpu.memory_space<vmem>>, vector<16x32xf32>
    %cst = arith.constant dense<0.000000e+00> : vector<16xf32>
    %1 = vector.multi_reduction <add>, %0, %cst [1] : vector<16x32xf32> to vector<16xf32>
    %2 = vector.shape_cast %1 : vector<16xf32> to vector<16x1xf32>
    %cst_1 = arith.constant 3.200000e+01 : f32
    %3 = vector.broadcast %cst_1 : f32 to vector<16x1xf32>
    %4 = arith.divf %2, %3 : vector<16x1xf32>
    %5 = vector.broadcast %4 : vector<16x1xf32> to vector<16x32xf32>
    %6 = arith.subf %0, %5 : vector<16x32xf32>
    %7 = arith.mulf %6, %6 : vector<16x32xf32>
    %cst_2 = arith.constant dense<0.000000e+00> : vector<16xf32>
    %8 = vector.multi_reduction <add>, %7, %cst_2 [1] : vector<16x32xf32> to vector<16xf32>
    %9 = vector.shape_cast %8 : vector<16xf32> to vector<16x1xf32>
    %cst_3 = arith.constant 3.200000e+01 : f32
    %10 = vector.broadcast %cst_3 : f32 to vector<16x1xf32>
    %11 = arith.divf %9, %10 : vector<16x1xf32>
    %cst_4 = arith.constant 9.99999974E-6 : f32
    %12 = vector.broadcast %cst_4 : f32 to vector<16x1xf32>
    %13 = arith.addf %11, %12 : vector<16x1xf32>
    %14 = math.rsqrt %13 : vector<16x1xf32>
    %15 = vector.broadcast %14 : vector<16x1xf32> to vector<16x32xf32>
    %16 = arith.mulf %6, %15 : vector<16x32xf32>
    %c0_5 = arith.constant 0 : index
    %c0_6 = arith.constant 0 : index
    %17 = vector.load %arg2[%c0_5, %c0_6] : memref<1x32xf32, #tpu.memory_space<vmem>>, vector<1x32xf32>
    %18 = vector.broadcast %17 : vector<1x32xf32> to vector<16x32xf32>
    %19 = arith.mulf %16, %18 : vector<16x32xf32>
    %c0_7 = arith.constant 0 : index
    %c0_8 = arith.constant 0 : index
    %20 = vector.load %arg3[%c0_7, %c0_8] : memref<1x32xf32, #tpu.memory_space<vmem>>, vector<1x32xf32>
    %21 = vector.broadcast %20 : vector<1x32xf32> to vector<16x32xf32>
    %22 = arith.addf %19, %21 : vector<16x32xf32>
    %23 = arith.truncf %22 : vector<16x32xf32> to vector<16x32xbf16>
    %c0_9 = arith.constant 0 : index
    %c0_10 = arith.constant 0 : index
    %24 = vector.load %arg4[%c0_9, %c0_10] : memref<32x64xbf16, #tpu.memory_space<vmem>>, vector<32x64xbf16>
    %cst_11 = arith.constant dense<0.000000e+00> : vector<16x64xf32>
    %25 = tpu.matmul %23, %24, %cst_11 {dimension_numbers = #tpu.dot_dimension_numbers<[1], [0], [0], [1], [0, 0, 1, 1], [], []>} : vector<16x32xbf16>, vector<32x64xbf16>, vector<16x64xf32> -> vector<16x64xf32>
    %c0_12 = arith.constant 0 : index
    %c0_13 = arith.constant 0 : index
    %26 = vector.load %arg5[%c0_12, %c0_13] : memref<1x64xf32, #tpu.memory_space<vmem>>, vector<1x64xf32>
    %27 = vector.broadcast %26 : vector<1x64xf32> to vector<16x64xf32>
    %28 = arith.addf %25, %27 : vector<16x64xf32>
    %29 = arith.mulf %28, %28 : vector<16x64xf32>
    %30 = arith.mulf %28, %29 : vector<16x64xf32>
    %cst_14 = arith.constant 4.471500e-02 : f32
    %31 = vector.broadcast %cst_14 : f32 to vector<16x64xf32>
    %32 = arith.mulf %31, %30 : vector<16x64xf32>
    %33 = arith.addf %28, %32 : vector<16x64xf32>
    %cst_15 = arith.constant 0.797884583 : f32
    %34 = vector.broadcast %cst_15 : f32 to vector<16x64xf32>
    %35 = arith.mulf %34, %33 : vector<16x64xf32>
    %36 = math.tanh %35 : vector<16x64xf32>
    %cst_16 = arith.constant 1.000000e+00 : f32
    %37 = vector.broadcast %cst_16 : f32 to vector<16x64xf32>
    %38 = arith.addf %37, %36 : vector<16x64xf32>
    %cst_17 = arith.constant 5.000000e-01 : f32
    %39 = vector.broadcast %cst_17 : f32 to vector<16x64xf32>
    %40 = arith.mulf %39, %38 : vector<16x64xf32>
    %41 = arith.mulf %28, %40 : vector<16x64xf32>
    %42 = arith.truncf %41 : vector<16x64xf32> to vector<16x64xbf16>
    %c0_18 = arith.constant 0 : index
    %c0_19 = arith.constant 0 : index
    %43 = vector.load %arg6[%c0_18, %c0_19] : memref<64x32xbf16, #tpu.memory_space<vmem>>, vector<64x32xbf16>
    %cst_20 = arith.constant dense<0.000000e+00> : vector<16x32xf32>
    %44 = tpu.matmul %42, %43, %cst_20 {dimension_numbers = #tpu.dot_dimension_numbers<[1], [0], [0], [1], [0, 0, 1, 1], [], []>} : vector<16x64xbf16>, vector<64x32xbf16>, vector<16x32xf32> -> vector<16x32xf32>
    %c0_21 = arith.constant 0 : index
    %c0_22 = arith.constant 0 : index
    %45 = vector.load %arg7[%c0_21, %c0_22] : memref<1x32xf32, #tpu.memory_space<vmem>>, vector<1x32xf32>
    %46 = vector.broadcast %45 : vector<1x32xf32> to vector<16x32xf32>
    %47 = arith.addf %44, %46 : vector<16x32xf32>
    %48 = arith.addf %47, %0 : vector<16x32xf32>
    %c0_23 = arith.constant 0 : index
    %c0_24 = arith.constant 0 : index
    %49 = vector.load %arg8[%c0_23, %c0_24] : memref<16x32xf32, #tpu.memory_space<vmem>>, vector<16x32xf32>
    tpu.vector_store %arg8[%c0_23, %c0_24], %48 {strides = array<i32>} : memref<16x32xf32, #tpu.memory_space<vmem>>, vector<16x32xf32>,
    return
  }
  func.func @transform_0(%arg0: i32) -> (i32, i32) {
    %c0_i32 = arith.constant 0 : i32
    %c0_i32_0 = arith.constant 0 : i32
    return %arg0, %c0_i32 : i32, i32
  }
  func.func @transform_1(%arg0: i32) -> (i32, i32) {
    %c0_i32 = arith.constant 0 : i32
    %c0_i32_0 = arith.constant 0 : i32
    %c0_i32_1 = arith.constant 0 : i32
    return %c0_i32, %c0_i32_0 : i32, i32
  }
  func.func @transform_2(%arg0: i32) -> (i32, i32) {
    %c0_i32 = arith.constant 0 : i32
    %c0_i32_0 = arith.constant 0 : i32
    %c0_i32_1 = arith.constant 0 : i32
    return %c0_i32, %c0_i32_0 : i32, i32
  }
  func.func @transform_3(%arg0: i32) -> (i32, i32) {
    %c0_i32 = arith.constant 0 : i32
    %c0_i32_0 = arith.constant 0 : i32
    %c0_i32_1 = arith.constant 0 : i32
    return %c0_i32, %c0_i32_0 : i32, i32
  }
  func.func @transform_4(%arg0: i32) -> (i32, i32) {
    %c0_i32 = arith.constant 0 : i32
    %c0_i32_0 = arith.constant 0 : i32
    %c0_i32_1 = arith.constant 0 : i32
    return %c0_i32, %c0_i32_0 : i32, i32
  }
  func.func @transform_5(%arg0: i32) -> (i32, i32) {
    %c0_i32 = arith.constant 0 : i32
    %c0_i32_0 = arith.constant 0 : i32
    %c0_i32_1 = arith.constant 0 : i32
    return %c0_i32, %c0_i32_0 : i32, i32
  }
  func.func @transform_6(%arg0: i32) -> (i32, i32) {
    %c0_i32 = arith.constant 0 : i32
    %c0_i32_0 = arith.constant 0 : i32
    %c0_i32_1 = arith.constant 0 : i32
    return %c0_i32, %c0_i32_0 : i32, i32
  }
  func.func @transform_7(%arg0: i32) -> (i32, i32) {
    %c0_i32 = arith.constant 0 : i32
    %c0_i32_0 = arith.constant 0 : i32
    return %arg0, %c0_i32 : i32, i32
  }
}

</mosaic_0001>

<bundles_post_ra>
// kernel: tpu_custom_call.1
= control target key start
LH: loop header
LB: loop body
LE: loop exit
PB: predicated region body
PF: predicated region fallthrough
CT: control target
= control target key end

     0   :  { %vm30_vm0 = vcmask 261120   ;;  %s460_s0 = inlined_call_operand.vmem [shape: f32[16,32], index: 0, kind: input, shape index: {}]   ;;  %s461_s1 = inlined_call_operand.vmem [shape: f32[1,32], index: 1, kind: input, shape index: {}]   ;;  %s462_s2 = inlined_call_operand.vmem [shape: f32[1,32], index: 2, kind: input, shape index: {}]   ;;  %s463_s3 = inlined_call_operand.vmem [shape: bf16[32,64], index: 3, kind: input, shape index: {}]   ;;  %s464_s4 = inlined_call_operand.vmem [shape: f32[1,64], index: 4, kind: input, shape index: {}]   ;;  %s465_s5 = inlined_call_operand.vmem [shape: bf16[64,32], index: 5, kind: input, shape index: {}]   ;;  %s466_s6 = inlined_call_operand.vmem [shape: f32[1,32], index: 6, kind: input, shape index: {}]   ;;  %s467_s7 = inlined_call_operand.hbm [shape: f32[16,32], index: 7, kind: output, shape index: {}]  }
   0x1   :  { %v398_v0 = vld [vmem:[%s460_s0] sm:$0xff]  ;;  %v403_v1 = vld [vmem:[%s460_s0 + $0x8] sm:$0xff] }
   0x2   :  { %v31_v2 = vsel %vm30_vm0, %v398_v0, 0.0  ;;  %v34_v3 = vsel %vm30_vm0, %v403_v1, 0.0 }
   0x3   :  { %32 = vadd.xlane.f32.xlu0 %v31_v2 }
   0x4   :  { %12 = vsyncpa [#allocation3], 0  ;;  %v312_v14 = vld [vmem:[%s463_s3] sm:$0xff]   ;;  %v350_v15 = vmov 0.0   ;;  %v313_v16 = vld [vmem:[%s463_s3 + $0x8] sm:$0xff]   ;;  %vm351_vm1 = vmmov 0  }
   0x5   :  { %287 = vmatprep.subr.bf16.mxu0 %v350_v15  ;;  %295 = vmatprep.subr.bf16.mxu1 %v350_v15  ;;  %v267_v25 = vld [vmem:[%s461_s1] ss:$0 sm:$0xff]  ;;  %v315_v35 = vld [vmem:[%s465_s5 + $0x8] sm:$0xff]   ;;  %v316_v36 = vld [vmem:[%s465_s5 + $0x10] sm:$0xff]   ;;  %vm202_vm2 = vcmask 523264   ;;  %s352_s19 = smov [#allocation2]  }
   0x6   :  { %288 = vmatpush3.bf16.msra.mxu0 %v312_v14  ;;  %291 = vmatprep.mubr.msk.bf16.mxu0 %vm351_vm1, %v350_v15  ;;  %v268_v29 = vld [vmem:[%s462_s2] ss:$0 sm:$0xff]  ;;  %v317_v37 = vld [vmem:[%s465_s5 + $0x18] sm:$0xff]   ;;  %s256_s20 = sshll.u32 %s352_s19, 4  ;;  %s257_s20 = int_to_ptr.vmem [resolvable:$true] %s256_s20 }
   0x7   :  { %35 = vadd.xlane.f32.xlu0 %v34_v3  ;;  %289 = vmatprep.subr.bf16.mxu0 %v350_v15  ;;  %v314_v34 = vld [vmem:[%s465_s5] sm:$0xff]   ;;  %s326_s21 = scalar_lea.vmem %s257_s20, 256  ;;  %p331_p1 = scmp.lt.s32.totalorder %s257_s20, %s257_s20 }
   0x8   :  { %303 = vmatprep.mubr.msk.bf16.mxu1 %vm351_vm1, %v350_v15  ;;  %296 = vmatpush3.bf16.msra.mxu1 %v314_v34  ;;  %v269_v38 = vld [vmem:[%s464_s4] ss:$0 sm:$0xff]  ;;  %p327_p0 = scmp.ne.s32.totalorder %s257_s20, %s326_s21  ;;  %p332_p2 = scmp.lt.s32.totalorder %s326_s21, %s326_s21 }
   0x9   :  { %297 = vmatprep.subr.bf16.mxu1 %v350_v15  ;;  %v273_v2 = vld [vmem:[%s466_s6] ss:$0 sm:$0xff] }
   0xa   :  { %290 = vmatpush3.bf16.msra.mxu0 %v313_v16  ;;  %p333_p3 = por %p332_p2, %p331_p1 }
   0xc   :  { %298 = vmatpush3.bf16.msra.mxu1 %v315_v35  ;;  %p334_p4 = pnand %p333_p3, %p327_p0 }
   0xd   :  { %299 = vmatprep.subr.bf16.mxu1 %v350_v15 }
  0x10   :  { %300 = vmatpush3.bf16.msra.mxu1 %v316_v36 }
  0x11   :  { %301 = vmatprep.subr.bf16.mxu1 %v350_v15 }
  0x14   :  { %302 = vmatpush3.bf16.msra.mxu1 %v317_v37 }
  0x90   :  { %v33_v4 = vpop.xlane.xlu0 %32 }
  0x91   :  { %v38_v5 = vmul.f32 0.03125, %v33_v4 }
  0x93   :  { %v40_v6 = vsub.f32 %v398_v0, %v38_v5 }
  0x94   :  { %v36_v7 = vpop.xlane.xlu0 %35 }
  0x95   :  { %v39_v8 = vmul.f32 0.03125, %v36_v7  ;;  %v42_v9 = vmul.f32 %v40_v6, %v40_v6 }
  0x97   :  { %v41_v10 = vsub.f32 %v403_v1, %v39_v8  ;;  %v44_v11 = vsel %vm30_vm0, %v42_v9, 0.0 }
  0x98   :  { %45 = vadd.xlane.f32.xlu1 %v44_v11 }
  0x99   :  { %v43_v12 = vmul.f32 %v41_v10, %v41_v10 }
  0x9b   :  { %v47_v13 = vsel %vm30_vm0, %v43_v12, 0.0 }
  0x9c   :  { %48 = vadd.xlane.f32.xlu1 %v47_v13 }
 0x125   :  { %v46_v17 = vpop.xlane.xlu1 %45 }
 0x126   :  { %v50_v18 = vmul.f32 0.03125, %v46_v17 }
 0x128   :  { %v52_v19 = vadd.f32 1e-05, %v50_v18 }
 0x129   :  { %v49_v20 = vpop.xlane.xlu1 %48 }
 0x12a   :  { %318 = vrsqrt.f32 %v52_v19  ;;  %v51_v21 = vmul.f32 0.03125, %v49_v20 }
 0x12c   :  { %v53_v22 = vadd.f32 1e-05, %v51_v21 }
 0x12e   :  { %320 = vrsqrt.f32 %v53_v22 }
 0x134   :  { %v319_v23 = vpop.eup %318 }
 0x135   :  { %v56_v24 = vmul.f32 %v319_v23, %v40_v6 }
 0x137   :  { %v65_v28 = vmul.f32 %v267_v25, %v56_v24 }
 0x138   :  { %v321_v26 = vpop.eup %320 }
 0x139   :  { %v57_v27 = vmul.f32 %v321_v26, %v41_v10  ;;  %v74_v31 = vadd.f32 %v268_v29, %v65_v28 }
 0x13b   :  { %v66_v30 = vmul.f32 %v267_v25, %v57_v27 }
 0x13d   :  { %v75_v32 = vadd.f32 %v268_v29, %v66_v30 }
 0x13f   :  { %v76_v33 = vpack.c.bf16 %v75_v32, %v74_v31 }
 0x141   :  { %292 = vmatmul.mubr.msk.bf16.vlgmr.msra.gmra.mrb[0].mxu0 %vm30_vm0, %v76_v33 }
 0x214   :  { %v137_v39 = vpop.f32.mrb[0].mxu0 }
 0x215   :  { %v138_v40 = vadd.f32 %v269_v38, %v137_v39  ;;  %v293_v41 = vpop.f32.mrb[1].mxu0 }
 0x216   :  { %v140_v42 = vpop.f32.mrb[2].mxu0 }
 0x217   :  { %v144_v43 = vmul.f32 %v138_v40, %v138_v40  ;;  %v141_v44 = vadd.f32 %v269_v38, %v140_v42  ;;  %v294_v45 = vpop.f32.mrb[3].mxu0 }
 0x219   :  { %v146_v46 = vmul.f32 %v144_v43, %v138_v40  ;;  %v145_v47 = vmul.f32 %v141_v44, %v141_v44 }
 0x21b   :  { %v148_v48 = vmul.f32 0.044715, %v146_v46  ;;  %v147_v49 = vmul.f32 %v145_v47, %v141_v44 }
 0x21d   :  { %v150_v50 = vadd.f32 %v148_v48, %v138_v40  ;;  %v149_v51 = vmul.f32 0.044715, %v147_v49 }
 0x21f   :  { %v152_v52 = vmul.f32 0.7978846, %v150_v50  ;;  %v151_v53 = vadd.f32 %v149_v51, %v141_v44 }
 0x221   :  { %322 = vtanh.f32 %v152_v52  ;;  %v153_v54 = vmul.f32 0.7978846, %v151_v53 }
 0x223   :  { %324 = vtanh.f32 %v153_v54 }
 0x22b   :  { %v323_v55 = vpop.eup %322 }
 0x22c   :  { %v156_v56 = vadd.f32 1.0, %v323_v55 }
 0x22d   :  { %v325_v57 = vpop.eup %324 }
 0x22e   :  { %v158_v58 = vmul.f32 0.5, %v156_v56  ;;  %v157_v59 = vadd.f32 1.0, %v325_v57 }
 0x230   :  { %v159_v60 = vmul.f32 0.5, %v157_v59  ;;  %v160_v61 = vmul.f32 %v158_v58, %v138_v40 }
 0x232   :  { %v161_v62 = vmul.f32 %v159_v60, %v141_v44 }
 0x234   :  { %v162_v63 = vpack.c.bf16 %v161_v62, %v160_v61 }
 0x236   :  { %304 = vmatmul.mubr.msk.bf16.vlgmr.msra.gmra.mrb[0].mxu1 %vm202_vm2, %v162_v63 }
 0x309   :  { %v240_v3 = vpop.f32.mrb[0].mxu1 }
 0x30a   :  { %v241_v4 = vadd.f32 %v273_v2, %v240_v3  ;;  %v305_v5 = vpop.f32.mrb[1].mxu1 }
 0x30b   :  { %v243_v6 = vpop.f32.mrb[2].mxu1 }
 0x30c   :  { %v247_v7 = vadd.f32 %v241_v4, %v398_v0  ;;  %v244_v8 = vadd.f32 %v273_v2, %v243_v6  ;;  %v306_v9 = vpop.f32.mrb[3].mxu1 }
 0x30e   :  { %249 = vst.msk [vmem:[#allocation2] sm:$0xff] %vm30_vm0, %v247_v7  ;;  %v248_v10 = vadd.f32 %v244_v8, %v403_v1 }
 0x310   :  { %250 = vst.msk [vmem:[#allocation2 + $0x8] sm:$0xff] %vm30_vm0, %v248_v10 }
 0x311   :  { %337 = shalt.err (!%p334_p4)
}
 0x312   :  { %s338_s23 = scalar_lea.hbm %s467_s7, 256 }
 0x313   :  { %p339_p5 = scmp.ne.s32.totalorder %s467_s7, %s338_s23  ;;  %p342_p6 = scmp.lt.u32.totalorder %s338_s23, %s467_s7 }
 0x315   :  { %p344_p7 = pnand %p342_p6, %p339_p5 }
 0x317   :  { %347 = shalt.err (!%p344_p7)
}
 0x318   :  { %s353_s0 = smov 128   ;;  %s354_s28 = smov 8  }
 0x319   :  { %262 = dma.vmem_to_hbm [thread:$0]  %s257_s20, 256, %s467_s7, [#allocation3], %s353_s0, %s353_s0, %s354_s28  }
 0x31a   :  { %348 = dma.done.wait [#allocation3], 256  }
 0x31b   :  { %349 = vsyncadd [#allocation3], 4294967040 }
 0x31c   :  { %266 = vsyncpa [#allocation3], 1 }

</bundles_post_ra>
